<compile_context>
chip_gen: v6e
topology: v6e:2x2x1
jax: 0.10.0
libtpu: 0.0.40
codegen_flags: <defaults>
</compile_context>

<pallas_src>
import jax
import jax.numpy as jnp
from jax.experimental import pallas as pl
from jax.experimental.pallas import tpu as pltpu  # noqa: F401  (TPU backend)


# ----------------------------- model dimensions -----------------------------
B = 2      # batch
Q = 8      # number of query vectors (decoder steps)
L = 16     # values / listener length
HS = 32    # hidden_size
FS = 32    # features_size
D = 64     # d_model


# --------------------------------- kernel -----------------------------------
def attention_block_kernel(
    s_ref,     # (B, Q, HS)  queries
    h_ref,     # (B, L, FS)  values (listener features)
    ws_ref,    # (HS, D)     s_matrix weight^T
    bs_ref,    # (1, D)      s_matrix bias
    wh_ref,    # (FS, D)     h_matrix weight^T
    bh_ref,    # (1, D)      h_matrix bias
    wf_ref,    # (D, D)      fc1 weight^T
    bf_ref,    # (1, D)      fc1 bias
    ctx_ref,   # (B, Q, D)   out: context
    attn_ref,  # (B, Q, L)   out: attention distribution
):
    # ---- Linear projections, flattened to 2-D for single MXU launches -------
    q = (jnp.dot(s_ref[...].reshape(B * Q, HS), ws_ref[...],
                 preferred_element_type=jnp.float32)
         + bs_ref[...]).reshape(B, Q, D)                              # s_matrix
    v = (jnp.dot(h_ref[...].reshape(B * L, FS), wh_ref[...],
                 preferred_element_type=jnp.float32)
         + bh_ref[...]).reshape(B, L, D)                              # h_matrix

    # ---- attention scores : bmm(q, v^T) on the MXU ---------------------------
    scores = jnp.einsum("bqd,bld->bql", q, v,
                        preferred_element_type=jnp.float32)           # (B, Q, L)
    scores = scores - jnp.max(scores, axis=-1, keepdims=True)
    e = jnp.exp(scores)
    att = e * pl.reciprocal(jnp.sum(e, axis=-1, keepdims=True), approx=True)

    # ---- context : bmm(att, v), then fc1 -------------------------------------
    ctx = jnp.einsum("bql,bld->bqd", att, v,
                     preferred_element_type=jnp.float32)              # (B, Q, D)
    ctx = (jnp.dot(ctx.reshape(B * Q, D), wf_ref[...],
                   preferred_element_type=jnp.float32)
           + bf_ref[...]).reshape(B, Q, D)                            # fc1

    ctx_ref[...] = ctx
    attn_ref[...] = att


# --------------------------------- wrapper ----------------------------------
def attention_block_forward(s_i, h, p):
    """s_i: (B, Q, HS) f32 queries; h: (B, L, FS) f32 values.
       -> (context (B, Q, D), attention_distribution (B, Q, L))."""
    return pl.pallas_call(
        attention_block_kernel,
        out_shape=(jax.ShapeDtypeStruct((B, Q, D), jnp.float32),
                   jax.ShapeDtypeStruct((B, Q, L), jnp.float32)),
    )(s_i, h, p["ws"], p["bs"], p["wh"], p["bh"], p["wf"], p["bf"])


# ------------------------- pure-JAX reference (check) ------------------------
def attention_block_reference(s_i, h, p):
    q = s_i @ p["ws"] + p["bs"]                                       # (B, Q, D)
    v = jnp.einsum("blf,fd->bld", h, p["wh"]) + p["bh"]               # (B, L, D)
    scores = jnp.einsum("bqd,bld->bql", q, v)                         # (B, Q, L)
    att = jax.nn.softmax(scores, axis=-1)
    ctx = jnp.einsum("bql,bld->bqd", att, v)                          # (B, Q, D)
    ctx = ctx @ p["wf"] + p["bf"]
    return ctx, att


# --------------------------------- params ------------------------------------
def init_params(key):
    ks = jax.random.split(key, 6)
    r = lambda k, shp, s=0.1: jax.random.normal(k, shp, jnp.float32) * s
    return {
        # Linear weights stored transposed (in_features, out_features)
        "ws": r(ks[0], (HS, D)), "bs": r(ks[1], (1, D)),   # s_matrix
        "wh": r(ks[2], (FS, D)), "bh": r(ks[3], (1, D)),   # h_matrix
        "wf": r(ks[4], (D, D)),  "bf": r(ks[5], (1, D)),   # fc1
    }
    # TODO(synk): droprate is stored in the PyTorch module but no Dropout layer
    # is ever applied in forward(), so nothing to translate.


if __name__ == "__main__":
    key = jax.random.PRNGKey(0)
    kp, kq, kh = jax.random.split(key, 3)
    params = init_params(kp)
    s_i = jax.random.normal(kq, (B, Q, HS), jnp.float32)   # queries (decoder states)
    h = jax.random.normal(kh, (B, L, FS), jnp.float32)     # values (listener features)

    ctx, attn = attention_block_forward(s_i, h, params)
    ctx = jax.block_until_ready(ctx)
    attn = jax.block_until_ready(attn)

    ref_ctx, ref_attn = attention_block_reference(s_i, h, params)
    assert ctx.shape == (B, Q, D) and attn.shape == (B, Q, L)
    # tolerance accounts for pl.reciprocal(approx=True) in the softmax denominator
    assert jnp.allclose(ctx, ref_ctx, atol=2e-3, rtol=2e-3)
    assert jnp.allclose(attn, ref_attn, atol=2e-3, rtol=2e-3)

    print("KERNEL_OK")
</pallas_src>

<mosaic_0001>
module attributes {stable_mosaic.version = 11 : i64} {
  func.func @attention_block_kernel(%arg0: memref<2x8x32xf32, #tpu.memory_space<vmem>>, %arg1: memref<2x16x32xf32, #tpu.memory_space<vmem>>, %arg2: memref<32x64xf32, #tpu.memory_space<vmem>>, %arg3: memref<1x64xf32, #tpu.memory_space<vmem>>, %arg4: memref<32x64xf32, #tpu.memory_space<vmem>>, %arg5: memref<1x64xf32, #tpu.memory_space<vmem>>, %arg6: memref<64x64xf32, #tpu.memory_space<vmem>>, %arg7: memref<1x64xf32, #tpu.memory_space<vmem>>, %arg8: memref<2x8x64xf32, #tpu.memory_space<vmem>>, %arg9: memref<2x8x16xf32, #tpu.memory_space<vmem>>) attributes {dimension_semantics = [], scalar_prefetch = 0 : i64, scratch_operands = 0 : i64, tpu.core_type = #tpu.core_type<tc>} {
    %c0 = arith.constant 0 : index
    %c0_0 = arith.constant 0 : index
    %c0_1 = arith.constant 0 : index
    %0 = vector.load %arg0[%c0, %c0_0, %c0_1] : memref<2x8x32xf32, #tpu.memory_space<vmem>>, vector<2x8x32xf32>
    %1 = vector.shape_cast %0 : vector<2x8x32xf32> to vector<16x32xf32>
    %c0_2 = arith.constant 0 : index
    %c0_3 = arith.constant 0 : index
    %2 = vector.load %arg2[%c0_2, %c0_3] : memref<32x64xf32, #tpu.memory_space<vmem>>, vector<32x64xf32>
    %cst = arith.constant dense<0.000000e+00> : vector<16x64xf32>
    %3 = tpu.matmul %1, %2, %cst {dimension_numbers = #tpu.dot_dimension_numbers<[1], [0], [0], [1], [0, 0, 1, 1], [], []>} : vector<16x32xf32>, vector<32x64xf32>, vector<16x64xf32> -> vector<16x64xf32>
    %c0_4 = arith.constant 0 : index
    %c0_5 = arith.constant 0 : index
    %4 = vector.load %arg3[%c0_4, %c0_5] : memref<1x64xf32, #tpu.memory_space<vmem>>, vector<1x64xf32>
    %5 = vector.broadcast %4 : vector<1x64xf32> to vector<16x64xf32>
    %6 = arith.addf %3, %5 : vector<16x64xf32>
    %7 = vector.shape_cast %6 : vector<16x64xf32> to vector<2x8x64xf32>
    %c0_6 = arith.constant 0 : index
    %c0_7 = arith.constant 0 : index
    %c0_8 = arith.constant 0 : index
    %8 = vector.load %arg1[%c0_6, %c0_7, %c0_8] : memref<2x16x32xf32, #tpu.memory_space<vmem>>, vector<2x16x32xf32>
    %9 = vector.shape_cast %8 : vector<2x16x32xf32> to vector<32x32xf32>
    %c0_9 = arith.constant 0 : index
    %c0_10 = arith.constant 0 : index
    %10 = vector.load %arg4[%c0_9, %c0_10] : memref<32x64xf32, #tpu.memory_space<vmem>>, vector<32x64xf32>
    %cst_11 = arith.constant dense<0.000000e+00> : vector<32x64xf32>
    %11 = tpu.matmul %9, %10, %cst_11 {dimension_numbers = #tpu.dot_dimension_numbers<[1], [0], [0], [1], [0, 0, 1, 1], [], []>} : vector<32x32xf32>, vector<32x64xf32>, vector<32x64xf32> -> vector<32x64xf32>
    %c0_12 = arith.constant 0 : index
    %c0_13 = arith.constant 0 : index
    %12 = vector.load %arg5[%c0_12, %c0_13] : memref<1x64xf32, #tpu.memory_space<vmem>>, vector<1x64xf32>
    %13 = vector.broadcast %12 : vector<1x64xf32> to vector<32x64xf32>
    %14 = arith.addf %11, %13 : vector<32x64xf32>
    %15 = vector.shape_cast %14 : vector<32x64xf32> to vector<2x16x64xf32>
    "tpu.trace_start"() <{level = 10 : i32, message = "bqd,bld->bql"}> : () -> ()
    %cst_14 = arith.constant dense<0.000000e+00> : vector<2x8x16xf32>
    %16 = tpu.matmul %7, %15, %cst_14 {dimension_numbers = #tpu.dot_dimension_numbers<[2], [2], [1], [1], [0, 0, 0, 1, 1, 1], [0], [0]>} : vector<2x8x64xf32>, vector<2x16x64xf32>, vector<2x8x16xf32> -> vector<2x8x16xf32>
    "tpu.trace_stop"() : () -> ()
    %cst_15 = arith.constant dense<0xFF800000> : vector<2x8xf32>
    %17 = vector.multi_reduction <maximumf>, %16, %cst_15 [2] : vector<2x8x16xf32> to vector<2x8xf32>
    %18 = vector.shape_cast %17 : vector<2x8xf32> to vector<2x8x1xf32>
    %19 = vector.broadcast %18 : vector<2x8x1xf32> to vector<2x8x16xf32>
    %20 = arith.subf %16, %19 : vector<2x8x16xf32>
    %21 = math.exp %20 : vector<2x8x16xf32>
    %cst_16 = arith.constant dense<0.000000e+00> : vector<2x8xf32>
    %22 = vector.multi_reduction <add>, %21, %cst_16 [2] : vector<2x8x16xf32> to vector<2x8xf32>
    %23 = vector.shape_cast %22 : vector<2x8xf32> to vector<2x8x1xf32>
    %24 = tpu.reciprocal %23 {approx = true} : vector<2x8x1xf32> -> vector<2x8x1xf32>
    %25 = vector.broadcast %24 : vector<2x8x1xf32> to vector<2x8x16xf32>
    %26 = arith.mulf %21, %25 : vector<2x8x16xf32>
    "tpu.trace_start"() <{level = 10 : i32, message = "bql,bld->bqd"}> : () -> ()
    %cst_17 = arith.constant dense<0.000000e+00> : vector<2x8x64xf32>
    %27 = tpu.matmul %26, %15, %cst_17 {dimension_numbers = #tpu.dot_dimension_numbers<[2], [1], [1], [2], [0, 0, 0, 1, 1, 2], [0], [0]>} : vector<2x8x16xf32>, vector<2x16x64xf32>, vector<2x8x64xf32> -> vector<2x8x64xf32>
    "tpu.trace_stop"() : () -> ()
    %28 = vector.shape_cast %27 : vector<2x8x64xf32> to vector<16x64xf32>
    %c0_18 = arith.constant 0 : index
    %c0_19 = arith.constant 0 : index
    %29 = vector.load %arg6[%c0_18, %c0_19] : memref<64x64xf32, #tpu.memory_space<vmem>>, vector<64x64xf32>
    %cst_20 = arith.constant dense<0.000000e+00> : vector<16x64xf32>
    %30 = tpu.matmul %28, %29, %cst_20 {dimension_numbers = #tpu.dot_dimension_numbers<[1], [0], [0], [1], [0, 0, 1, 1], [], []>} : vector<16x64xf32>, vector<64x64xf32>, vector<16x64xf32> -> vector<16x64xf32>
    %c0_21 = arith.constant 0 : index
    %c0_22 = arith.constant 0 : index
    %31 = vector.load %arg7[%c0_21, %c0_22] : memref<1x64xf32, #tpu.memory_space<vmem>>, vector<1x64xf32>
    %32 = vector.broadcast %31 : vector<1x64xf32> to vector<16x64xf32>
    %33 = arith.addf %30, %32 : vector<16x64xf32>
    %34 = vector.shape_cast %33 : vector<16x64xf32> to vector<2x8x64xf32>
    %c0_23 = arith.constant 0 : index
    %c0_24 = arith.constant 0 : index
    %c0_25 = arith.constant 0 : index
    %35 = vector.load %arg8[%c0_23, %c0_24, %c0_25] : memref<2x8x64xf32, #tpu.memory_space<vmem>>, vector<2x8x64xf32>
    tpu.vector_store %arg8[%c0_23, %c0_24, %c0_25], %34 {strides = array<i32>} : memref<2x8x64xf32, #tpu.memory_space<vmem>>, vector<2x8x64xf32>,
    %c0_26 = arith.constant 0 : index
    %c0_27 = arith.constant 0 : index
    %c0_28 = arith.constant 0 : index
    %36 = vector.load %arg9[%c0_26, %c0_27, %c0_28] : memref<2x8x16xf32, #tpu.memory_space<vmem>>, vector<2x8x16xf32>
    tpu.vector_store %arg9[%c0_26, %c0_27, %c0_28], %26 {strides = array<i32>} : memref<2x8x16xf32, #tpu.memory_space<vmem>>, vector<2x8x16xf32>,
    return
  }
}

</mosaic_0001>

<bundles_post_ra>
// kernel: tpu_custom_call.1
= control target key start
LH: loop header
LB: loop body
LE: loop exit
PB: predicated region body
PF: predicated region fallthrough
CT: control target
= control target key end

     0   :  { %15 = vsyncpa [#allocation3], 0  ;;  %s1207_s0 = inlined_call_operand.hbm [shape: f32[2,8,32], index: 0, kind: input, shape index: {}]   ;;  %s1208_s1 = inlined_call_operand.hbm [shape: f32[2,16,32], index: 1, kind: input, shape index: {}]   ;;  %s1209_s2 = inlined_call_operand.hbm [shape: f32[32,64], index: 2, kind: input, shape index: {}]   ;;  %s1210_s3 = inlined_call_operand.vmem [shape: f32[1,64], index: 3, kind: input, shape index: {}]   ;;  %s1211_s4 = inlined_call_operand.hbm [shape: f32[32,64], index: 4, kind: input, shape index: {}]   ;;  %s1212_s5 = inlined_call_operand.vmem [shape: f32[1,64], index: 5, kind: input, shape index: {}]   ;;  %s1213_s6 = inlined_call_operand.hbm [shape: f32[64,64], index: 6, kind: input, shape index: {}]   ;;  %s1214_s7 = inlined_call_operand.vmem [shape: f32[1,64], index: 7, kind: input, shape index: {}]   ;;  %s1215_s8 = inlined_call_operand.hbm [shape: f32[2,8,64], index: 8, kind: output, shape index: {0}]   ;;  %s1216_s9 = inlined_call_operand.hbm [shape: f32[2,8,16], index: 9, kind: output, shape index: {1}]  }
   0x1   :  { %16 = vsyncpa [#allocation6], 0 }
   0x2   :  { %17 = vsyncpa [#allocation9], 0 }
   0x3   :  { %18 = vsyncpa [#allocation4], 0 }
   0x4   :  { %19 = vsyncpa [#allocation13], 0  ;;  %s1067_s30 = smov [#allocation5]   ;;  %s1068_s11 = smov [#allocation8]  }
   0x5   :  { %s37_s10 = sshll.u32 %s1067_s30, 4  ;;  %s63_s12 = sshll.u32 %s1068_s11, 4  ;;  %s38_s10 = int_to_ptr.vmem [resolvable:$true] %s37_s10  ;;  %s64_s12 = int_to_ptr.vmem [resolvable:$true] %s63_s12 }
   0x6   :  { %s925_s13 = scalar_lea.vmem %s38_s10, 512  ;;  %p930_p1 = scmp.lt.s32.totalorder %s38_s10, %s38_s10 }
   0x7   :  { %p926_p0 = scmp.ne.s32.totalorder %s38_s10, %s925_s13  ;;  %p931_p2 = scmp.lt.s32.totalorder %s925_s13, %s925_s13 }
   0x9   :  { %p932_p3 = por %p931_p2, %p930_p1 }
   0xb   :  { %p933_p4 = pnand %p932_p3, %p926_p0 }
   0xd   :  { %936 = shalt.err (!%p933_p4)
}
   0xe   :  { %s1069_s14 = smov 128   ;;  %s1070_s15 = smov 8  }
   0xf   :  { %43 = dma.hbm_to_vmem [thread:$0]  %s1208_s1, 512, %s38_s10, [#allocation6], %s1069_s14, %s1069_s14, %s1070_s15  }
  0x10   :  { %s945_s18 = scalar_lea.vmem %s64_s12, 512  ;;  %p950_p6 = scmp.lt.s32.totalorder %s64_s12, %s64_s12 }
  0x11   :  { %p946_p5 = scmp.ne.s32.totalorder %s64_s12, %s945_s18  ;;  %p951_p7 = scmp.lt.s32.totalorder %s945_s18, %s945_s18 }
  0x13   :  { %p952_p8 = por %p951_p7, %p950_p6 }
  0x15   :  { %p953_p9 = pnand %p952_p8, %p946_p5 }
  0x17   :  { %956 = shalt.err (!%p953_p9)
}
  0x18   :  { %69 = dma.hbm_to_vmem [thread:$0]  %s1211_s4, 512, %s64_s12, [#allocation9], %s1069_s14, %s1069_s14, %s1070_s15  }
  0x19   :  { %s1071_s21 = smov [#allocation2]   ;;  %s1072_s23 = smov [#allocation7]  }
  0x1a   :  { %s25_s22 = sshll.u32 %s1071_s21, 4  ;;  %s49_s24 = sshll.u32 %s1072_s23, 4  ;;  %s26_s22 = int_to_ptr.vmem [resolvable:$true] %s25_s22  ;;  %s50_s24 = int_to_ptr.vmem [resolvable:$true] %s49_s24 }
  0x1b   :  { %s965_s1 = scalar_lea.vmem %s26_s22, 256  ;;  %p970_p11 = scmp.lt.s32.totalorder %s26_s22, %s26_s22 }
  0x1c   :  { %p966_p10 = scmp.ne.s32.totalorder %s26_s22, %s965_s1  ;;  %p971_p12 = scmp.lt.s32.totalorder %s965_s1, %s965_s1 }
  0x1e   :  { %p972_p13 = por %p971_p12, %p970_p11 }
  0x20   :  { %p973_p0 = pnand %p972_p13, %p966_p10 }
  0x22   :  { %976 = shalt.err (!%p973_p0)
}
  0x23   :  { %31 = dma.hbm_to_vmem [thread:$0]  %s1207_s0, 256, %s26_s22, [#allocation3], %s1069_s14, %s1069_s14, %s1070_s15  }
  0x24   :  { %s985_s4 = scalar_lea.vmem %s50_s24, 512  ;;  %p990_p2 = scmp.lt.s32.totalorder %s50_s24, %s50_s24 }
  0x25   :  { %p986_p1 = scmp.ne.s32.totalorder %s50_s24, %s985_s4  ;;  %p991_p3 = scmp.lt.s32.totalorder %s985_s4, %s985_s4 }
  0x27   :  { %p992_p4 = por %p991_p3, %p990_p2 }
  0x29   :  { %p993_p5 = pnand %p992_p4, %p986_p1 }
  0x2b   :  { %996 = shalt.err (!%p993_p5)
}
  0x2c   :  { %55 = dma.hbm_to_vmem [thread:$0]  %s1209_s2, 512, %s50_s24, [#allocation6], %s1069_s14, %s1069_s14, %s1070_s15  }
  0x2d   :  { %s1073_s29 = smov [#allocation10]  }
  0x2e   :  { %s77_s30 = sshll.u32 %s1073_s29, 4  ;;  %s78_s30 = int_to_ptr.vmem [resolvable:$true] %s77_s30 }
  0x2f   :  { %s1005_s10 = scalar_lea.vmem %s78_s30, 1024  ;;  %p1010_p7 = scmp.lt.s32.totalorder %s78_s30, %s78_s30 }
  0x30   :  { %p1006_p6 = scmp.ne.s32.totalorder %s78_s30, %s1005_s10  ;;  %p1011_p8 = scmp.lt.s32.totalorder %s1005_s10, %s1005_s10 }
  0x32   :  { %p1012_p9 = por %p1011_p8, %p1010_p7 }
  0x34   :  { %p1013_p10 = pnand %p1012_p9, %p1006_p6 }
  0x36   :  { %1016 = shalt.err (!%p1013_p10)
}
  0x37   :  { %83 = dma.hbm_to_vmem [thread:$0]  %s1213_s6, 1024, %s78_s30, [#allocation9], %s1069_s14, %s1069_s14, %s1070_s15  }
  0x38   :  { %1057 = dma.done.wait [#allocation3], 256  }
  0x39   :  { %1058 = vsyncadd [#allocation3], 4294967040 }
  0x3a   :  { %1059 = dma.done.wait [#allocation6], 1024  }
  0x3b   :  { %1060 = vsyncadd [#allocation6], 4294966272 }
  0x3c   :  { %1061 = dma.done.wait [#allocation9], 1536  }
  0x3d   :  { %1062 = vsyncadd [#allocation9], 4294965760  ;;  %vm114_vm0 = vcmask 261120   ;;  %v106_v0 = vld [vmem:[#allocation7 + $0x18] sm:$0xff]  ;;  %v105_v1 = vld [vmem:[#allocation7 + $0x10] sm:$0xff]  ;;  %v1074_v14 = vmov 0.0  }
  0x3e   :  { %826 = vmatprep.subr.mxu1 %v106_v0  ;;  %v101_v2 = vld [vmem:[#allocation2] sm:$0xff]  ;;  %v104_v3 = vld [vmem:[#allocation7 + $0x8] sm:$0xff]  ;;  %v103_v4 = vld [vmem:[#allocation7] sm:$0xff]  ;;  %851 = vmatprep.subr.mxu0 %v1074_v14  ;;  %vm1075_vm1 = vmmov 0   ;;  %vm308_vm2 = vcmask 523264   ;;  %vm467_vm3 = vcmask 130048  }
  0x3f   :  { %827 = vmatpush3.msra.mxu1 %v106_v0  ;;  %834 = vmatprep.mubr.msk.f32.mxu1 %vm114_vm0, %v101_v2  ;;  %v102_v5 = vld [vmem:[#allocation2 + $0x8] sm:$0xff]  ;;  %v196_v7 = vld [vmem:[#allocation5] sm:$0xff]  ;;  %v202_v8 = vld [vmem:[#allocation8 + $0x10] sm:$0xff] }
  0x40   :  { %828 = vmatprep.subr.mxu1 %v105_v1  ;;  %v203_v6 = vld [vmem:[#allocation8 + $0x18] sm:$0xff]  ;;  %v201_v9 = vld [vmem:[#allocation8 + $0x8] sm:$0xff]  ;;  %v200_v10 = vld [vmem:[#allocation8] sm:$0xff]  ;;  %855 = vmatprep.mubr.msk.f32.mxu0 %vm1075_vm1, %v1074_v14 }
  0x41   :  { %829 = vmatpush3.msra.mxu1 %v105_v1  ;;  %v197_v11 = vld [vmem:[#allocation5 + $0x8] sm:$0xff]  ;;  %v198_v12 = vld [vmem:[#allocation5 + $0x10] sm:$0xff]  ;;  %v199_v13 = vld [vmem:[#allocation5 + $0x18] sm:$0xff] }
  0x42   :  { %830 = vmatprep.subr.mxu1 %v104_v3  ;;  %v774_v17 = vld [vmem:[%s1212_s5] ss:$0 sm:$0xff]  ;;  %v643_v45 = vld [vmem:[#allocation10 + $0x38] sm:$0xff]  ;;  %v641_v52 = vld [vmem:[#allocation10 + $0x28] sm:$0xff] }
  0x43   :  { %831 = vmatpush3.msra.mxu1 %v104_v3  ;;  %v771_v22 = vld [vmem:[%s1210_s3] ss:$0 sm:$0xff]  ;;  %v640_v54 = vld [vmem:[#allocation10 + $0x20] sm:$0xff]  ;;  %v639_v55 = vld [vmem:[#allocation10 + $0x18] sm:$0xff]  ;;  %s1076_s3 = smov [#allocation12]  }
  0x44   :  { %832 = vmatprep.subr.mxu1 %v103_v4  ;;  %v642_v50 = vld [vmem:[#allocation10 + $0x30] sm:$0xff]  ;;  %v637_v57 = vld [vmem:[#allocation10 + $0x8] sm:$0xff]  ;;  %v636_v58 = vld [vmem:[#allocation10] sm:$0xff]  ;;  %s753_s5 = sshll.u32 %s1076_s3, 4  ;;  %s754_s5 = int_to_ptr.vmem [resolvable:$true] %s753_s5 }
  0x45   :  { %833 = vmatpush3.msra.mxu1 %v103_v4  ;;  %v638_v56 = vld [vmem:[#allocation10 + $0x10] sm:$0xff]  ;;  %s1017_s16 = scalar_lea.vmem %s754_s5, 256  ;;  %p1022_p12 = scmp.lt.s32.totalorder %s754_s5, %s754_s5 }
  0x46   :  { %835 = vmatmul.mubr.msk.f32.vlgmr.msra.gmra.mxu1 %vm114_vm0, %v102_v5  ;;  %837 = vmatprep.subr.mxu1 %v203_v6  ;;  %p1018_p11 = scmp.ne.s32.totalorder %s754_s5, %s1017_s16  ;;  %p1023_p13 = scmp.lt.s32.totalorder %s1017_s16, %s1017_s16 }
  0x47   :  { %838 = vmatpush3.msra.mxu1 %v203_v6  ;;  %845 = vmatprep.mubr.msk.f32.mxu1 %vm114_vm0, %v196_v7 }
  0x48   :  { %839 = vmatprep.subr.mxu1 %v202_v8  ;;  %p1024_p0 = por %p1023_p13, %p1022_p12 }
  0x49   :  { %840 = vmatpush3.msra.mxu1 %v202_v8 }
  0x4a   :  { %841 = vmatprep.subr.mxu1 %v201_v9  ;;  %p1025_p1 = pnand %p1024_p0, %p1018_p11 }
  0x4b   :  { %842 = vmatpush3.msra.mxu1 %v201_v9 }
  0x4c   :  { %843 = vmatprep.subr.mxu1 %v200_v10 }
  0x4d   :  { %844 = vmatpush3.msra.mxu1 %v200_v10 }
  0x4e   :  { %846 = vmatmul.mubr.msk.f32.vlgmr.msra.gmra.mxu1 %vm114_vm0, %v197_v11  ;;  %858 = vmatprep.subr.mxu1 %v1074_v14 }
  0x4f   :  { %848 = vmatprep.mubr.msk.f32.mxu1 %vm114_vm0, %v198_v12 }
  0x52   :  { %849 = vmatmul.mubr.msk.f32.gmra.mxu1 %vm114_vm0, %v199_v13 }
  0x53   :  { %862 = vmatprep.mubr.msk.f32.mxu1 %vm1075_vm1, %v1074_v14 }
 0x106   :  { %v836_v15 = vpop.f32.mrf.mxu1 }
 0x107   :  { %v193_v28 = vadd.f32 %v836_v15, %v771_v22 }
 0x108   :  { %v187_v16 = vpop.f32.mrf.mxu1 }
 0x109   :  { %v188_v26 = vadd.f32 %v771_v22, %v187_v16 }
 0x10e   :  { %v847_v18 = vpop.f32.mrf.mxu1 }
 0x10f   :  { %v295_v19 = vadd.f32 %v847_v18, %v774_v17 }
 0x110   :  { %v289_v20 = vpop.f32.mrf.mxu1 }
 0x111   :  { %852 = vmatpush3.xpose.msk.msra.mxu0 %vm308_vm2, %v295_v19  ;;  %v290_v23 = vadd.f32 %v774_v17, %v289_v20 }
 0x112   :  { %v850_v21 = vpop.f32.mrf.mxu1  ;;  %853 = vmatprep.subr.mxu0 %v1074_v14 }
 0x113   :  { %v305_v24 = vadd.f32 %v850_v21, %v774_v17 }
 0x114   :  { %v299_v25 = vpop.f32.mrf.mxu1 }
 0x115   :  { %854 = vmatpush3.xpose.msk.msra.mxu0 %vm308_vm2, %v290_v23  ;;  %859 = vmatpush3.xpose.msk.msra.mxu1 %vm308_vm2, %v305_v24  ;;  %v300_v27 = vadd.f32 %v774_v17, %v299_v25 }
 0x116   :  { %860 = vmatprep.subr.mxu1 %v1074_v14  ;;  %865 = vmatprep.subr.mxu0 %v1074_v14 }
 0x118   :  { %856 = vmatmul.mubr.msk.f32.vlgmr.msra.gmra.mxu0 %vm308_vm2, %v188_v26 }
 0x119   :  { %861 = vmatpush3.xpose.msk.msra.mxu1 %vm308_vm2, %v300_v27  ;;  %866 = vmatpush3.msra.mxu0 %v295_v19 }
 0x11a   :  { %867 = vmatprep.subr.mxu0 %v1074_v14  ;;  %872 = vmatprep.subr.mxu1 %v1074_v14 }
 0x11b   :  { %868 = vmatpush3.msra.mxu0 %v290_v23  ;;  %869 = vmatprep.mubr.msk.f32.mxu0 %vm1075_vm1, %v1074_v14 }
 0x11c   :  { %863 = vmatmul.mubr.msk.f32.vlgmr.msra.gmra.mxu1 %vm308_vm2, %v193_v28  ;;  %879 = vmatprep.subr.mxu0 %v643_v45 }
 0x11d   :  { %873 = vmatpush3.msra.mxu1 %v305_v24  ;;  %876 = vmatprep.mubr.msk.f32.mxu1 %vm1075_vm1, %v1074_v14 }
 0x11e   :  { %874 = vmatprep.subr.mxu1 %v1074_v14 }
 0x11f   :  { %875 = vmatpush3.msra.mxu1 %v300_v27 }
 0x1d8   :  { %v384_v29 = vpop.f32.mrf.mxu0 }
 0x1d9   :  { %v468_v30 = vsel %vm467_vm3, %v384_v29, -inf }
 0x1da   :  { %469 = vmax.xlane.f32.xlu0 %v468_v30  ;;  %v857_v31 = vpop.f32.mrf.mxu0 }
 0x1dc   :  { %v463_v32 = vpop.f32.mrf.mxu1 }
 0x1dd   :  { %v471_v33 = vsel %vm467_vm3, %v463_v32, -inf }
 0x1de   :  { %v864_v34 = vpop.f32.mrf.mxu1  ;;  %472 = vmax.xlane.f32.xlu0 %v471_v33 }
 0x263   :  { %v470_v35 = vpop.xlane.xlu0 %469 }
 0x264   :  { %v474_v36 = vsub.f32 %v384_v29, %v470_v35 }
 0x266   :  { %v476_v37 = vmul.f32 1.442695, %v474_v36 }
 0x267   :  { %v473_v38 = vpop.xlane.xlu0 %472 }
 0x268   :  { %909 = vpow2.f32 %v476_v37  ;;  %v475_v39 = vsub.f32 %v463_v32, %v473_v38 }
 0x26a   :  { %v478_v40 = vmul.f32 1.442695, %v475_v39 }
 0x26c   :  { %911 = vpow2.f32 %v478_v40 }
 0x275   :  { %v910_v41 = vpop.eup %909 }
 0x276   :  { %v480_v42 = vsel %vm467_vm3, %v910_v41, 0.0 }
 0x277   :  { %481 = vadd.xlane.f32.xlu1 %v480_v42 }
 0x279   :  { %v912_v43 = vpop.eup %911 }
 0x27a   :  { %v483_v44 = vsel %vm467_vm3, %v912_v43, 0.0 }
 0x27b   :  { %484 = vadd.xlane.f32.xlu1 %v483_v44 }
 0x300   :  { %v482_v46 = vpop.xlane.xlu1 %481 }
 0x301   :  { %913 = vrcp.f32 %v482_v46 }
 0x304   :  { %v485_v47 = vpop.xlane.xlu1 %484 }
 0x305   :  { %915 = vrcp.f32 %v485_v47 }
 0x30e   :  { %v914_v48 = vpop.eup %913 }
 0x30f   :  { %v488_v49 = vmul.f32 %v914_v48, %v910_v41 }
 0x311   :  { %870 = vmatmul.mubr.msk.f32.vlgmr.msra.gmra.mxu0 %vm467_vm3, %v488_v49  ;;  %734 = vst.msk [vmem:[#allocation12] sm:$0xff] %vm467_vm3, %v488_v49 }
 0x312   :  { %v916_v51 = vpop.eup %915  ;;  %880 = vmatpush3.msra.mxu0 %v643_v45 }
 0x313   :  { %v489_v53 = vmul.f32 %v916_v51, %v912_v43  ;;  %881 = vmatprep.subr.mxu0 %v642_v50 }
 0x314   :  { %882 = vmatpush3.msra.mxu0 %v642_v50 }
 0x315   :  { %877 = vmatmul.mubr.msk.f32.vlgmr.msra.gmra.mxu1 %vm467_vm3, %v489_v53  ;;  %735 = vst.msk [vmem:[#allocation12 + $0x8] sm:$0xff] %vm467_vm3, %v489_v53  ;;  %883 = vmatprep.subr.mxu0 %v641_v52 }
 0x316   :  { %884 = vmatpush3.msra.mxu0 %v641_v52 }
 0x317   :  { %885 = vmatprep.subr.mxu0 %v640_v54 }
 0x318   :  { %886 = vmatpush3.msra.mxu0 %v640_v54 }
 0x319   :  { %887 = vmatprep.subr.mxu0 %v639_v55 }
 0x31a   :  { %888 = vmatpush3.msra.mxu0 %v639_v55 }
 0x31b   :  { %889 = vmatprep.subr.mxu0 %v638_v56 }
 0x31c   :  { %890 = vmatpush3.msra.mxu0 %v638_v56 }
 0x31d   :  { %891 = vmatprep.subr.mxu0 %v637_v57 }
 0x31e   :  { %892 = vmatpush3.msra.mxu0 %v637_v57 }
 0x31f   :  { %893 = vmatprep.subr.mxu0 %v636_v58 }
 0x320   :  { %894 = vmatpush3.msra.mxu0 %v636_v58 }
 0x3d1   :  { %v559_v59 = vpop.f32.mrf.mxu0 }
 0x3d2   :  { %895 = vmatprep.mubr.msk.f32.mxu0 %vm308_vm2, %v559_v59 }
 0x3d3   :  { %v871_v60 = vpop.f32.mrf.mxu0 }
 0x3d5   :  { %v632_v61 = vpop.f32.mrf.mxu1 }
 0x3d6   :  { %896 = vmatmul.mubr.msk.f32.vlgmr.msra.gmra.mxu0 %vm308_vm2, %v632_v61 }
 0x3d7   :  { %v878_v62 = vpop.f32.mrf.mxu1 }
 0x3d8   :  { %1028 = shalt.err (!%p1025_p1)
}
 0x3d9   :  { %759 = dma.vmem_to_hbm [thread:$0]  %s754_s5, 256, %s1216_s9, [#allocation13], %s1069_s14, %s1069_s14, %s1070_s15  }
 0x3da   :  { %v787_v63 = vld [vmem:[%s1214_s7] ss:$0 sm:$0xff]  ;;  %s1077_s21 = smov [#allocation11]  }
 0x3db   :  { %s741_s22 = sshll.u32 %s1077_s21, 4  ;;  %s742_s22 = int_to_ptr.vmem [resolvable:$true] %s741_s22 }
 0x3dc   :  { %s1037_s23 = scalar_lea.vmem %s742_s22, 256  ;;  %p1042_p3 = scmp.lt.s32.totalorder %s742_s22, %s742_s22 }
 0x3dd   :  { %p1038_p2 = scmp.ne.s32.totalorder %s742_s22, %s1037_s23  ;;  %p1043_p4 = scmp.lt.s32.totalorder %s1037_s23, %s1037_s23 }
 0x3df   :  { %p1044_p5 = por %p1043_p4, %p1042_p3 }
 0x3e1   :  { %p1045_p6 = pnand %p1044_p5, %p1038_p2 }
 0x496   :  { %v897_v0 = vpop.f32.mrf.mxu0 }
 0x497   :  { %v729_v1 = vadd.f32 %v897_v0, %v787_v63 }
 0x498   :  { %v723_v2 = vpop.f32.mrf.mxu0 }
 0x499   :  { %733 = vst.msk [vmem:[#allocation11 + $0x8] sm:$0xff] %vm308_vm2, %v729_v1  ;;  %v724_v3 = vadd.f32 %v787_v63, %v723_v2 }
 0x49b   :  { %732 = vst.msk [vmem:[#allocation11] sm:$0xff] %vm308_vm2, %v724_v3 }
 0x49c   :  { %1048 = shalt.err (!%p1045_p6)
}
 0x49d   :  { %747 = dma.vmem_to_hbm [thread:$0]  %s742_s22, 256, %s1215_s8, [#allocation4], %s1069_s14, %s1069_s14, %s1070_s15  }
 0x49e   :  { %1063 = dma.done.wait [#allocation4], 256  }
 0x49f   :  { %1064 = vsyncadd [#allocation4], 4294967040 }
 0x4a0   :  { %1065 = dma.done.wait [#allocation13], 256  }
 0x4a1   :  { %1066 = vsyncadd [#allocation13], 4294967040 }
 0x4a2   :  { %766 = vsyncpa [#allocation3], 1 }
 0x4a3   :  { %767 = vsyncpa [#allocation6], 1 }
 0x4a4   :  { %768 = vsyncpa [#allocation9], 1 }
 0x4a5   :  { %769 = vsyncpa [#allocation4], 1 }
 0x4a6   :  { %770 = vsyncpa [#allocation13], 1 }

</bundles_post_ra>
